<compile_context>
chip_gen: v7x
topology: tpu7x:2x2x1
jax: 0.10.0
libtpu: 0.0.40
codegen_flags: <defaults>
</compile_context>

<pallas_src>
import functools

import jax
import jax.numpy as jnp
from jax.experimental import pallas as pl
from jax.experimental.pallas import tpu as pltpu


_VMEM_BUDGET = 36 * 1024 * 1024   # our own buffers (double-buffered) budget
_VMEM_LIMIT = 48 * 1024 * 1024    # scoped VMEM limit handed to Mosaic


def _round_up(x, m):
    return (x + m - 1) // m * m


# ------------------------------ kernels ------------------------------------

def _linear_kernel(x_ref, w_ref, b_ref, o_ref):
    """Whole-K tile: one MXU pass + bias add + store.  No accumulator."""
    acc = jnp.dot(x_ref[...], w_ref[...], preferred_element_type=jnp.float32)
    o_ref[...] = (acc + b_ref[...]).astype(o_ref.dtype)


def _linear_kernel_acc(x_ref, w_ref, b_ref, o_ref, acc_ref):
    """Fallback (very large d_model): K streamed along grid axis 2."""
    k = pl.program_id(2)

    @pl.when(k == 0)
    def _init():
        acc_ref[...] = jnp.zeros_like(acc_ref)

    acc_ref[...] += jnp.dot(
        x_ref[...], w_ref[...], preferred_element_type=jnp.float32)

    @pl.when(k == pl.num_programs(2) - 1)
    def _finalize():
        o_ref[...] = (acc_ref[...] + b_ref[...]).astype(o_ref.dtype)


# --------------------------- tile planning ----------------------------------

def _vmem_bytes(tm, tk, tn, xb, wb, ob, use_acc):
    total = 2 * tm * tk * xb          # activation tile, double-buffered
    total += 2 * tk * tn * wb         # weight slab, double-buffered
    total += 2 * tm * tn * ob         # output tile, double-buffered
    total += 2 * tn * 4               # bias row
    if use_acc:
        total += tm * tn * 4          # f32 accumulator scratch
    return total


def _choose_plan(K, N, xb, wb, ob, row_align):
    """Pick (tm_cap, tk, tn, use_acc) from the static (K, N) and dtype sizes."""
    Kp0 = _round_up(K, 128)
    Np0 = _round_up(N, 128)

    tm = min(1024, 1024)              # cap; per-call tm only shrinks from this
    tk = Kp0                          # prefer the whole reduction in VMEM
    tn = min(512, Np0)
    use_acc = False

    def fits():
        return _vmem_bytes(tm, tk, tn, xb, wb, ob, use_acc) <= _VMEM_BUDGET

    # Shed tm first (keeps the weight slab whole and tn wide), then tn, and
    # only then fall back to a K-tiled accumulator plan.
    while not fits() and tm > max(256, row_align):
        tm = max(max(256, row_align), _round_up(tm // 2, row_align))
    while not fits() and tn > 128:
        tn = max(128, tn // 2)
    if not fits():
        use_acc = True
        while not fits() and tk > 512:
            tk = max(512, _round_up(tk // 2, 128))
    return tm, tk, tn, use_acc


# ----------------------------- pallas entry ---------------------------------

def _pallas_linear(x2d, wT, b2d, tm, tk, tn, use_acc, out_dtype):
    """x2d: (Mp, Kp) padded, wT: (Kp, Np) padded, b2d: (1, Np) f32."""
    Mp, Kp = x2d.shape
    _, Np = wT.shape
    nj, ni, nk = Np // tn, Mp // tm, Kp // tk

    cost = pl.CostEstimate(
        flops=2 * Mp * Np * Kp,
        transcendentals=0,
        bytes_accessed=(Mp * Kp * x2d.dtype.itemsize
                        + Kp * Np * wT.dtype.itemsize
                        + Mp * Np * jnp.dtype(out_dtype).itemsize))

    if not use_acc:
        # grid = (vocab blocks, row blocks).  The weight index_map is constant
        # across the inner row axis, so each (Kp, tn) weight slab is DMA'd
        # exactly once; both axes are parallel for megacore sharding.
        params = pltpu.CompilerParams(
            dimension_semantics=("parallel", "parallel"),
            vmem_limit_bytes=_VMEM_LIMIT)
        return pl.pallas_call(
            _linear_kernel,
            out_shape=jax.ShapeDtypeStruct((Mp, Np), out_dtype),
            grid=(nj, ni),
            in_specs=[
                pl.BlockSpec((tm, Kp), lambda j, i: (i, 0)),   # activations
                pl.BlockSpec((Kp, tn), lambda j, i: (0, j)),   # weight slab
                pl.BlockSpec((1, tn), lambda j, i: (0, j)),    # bias row
            ],
            out_specs=pl.BlockSpec((tm, tn), lambda j, i: (i, j)),
            compiler_params=params,
            cost_estimate=cost,
        )(x2d, wT, b2d)

    # Fallback: K tiled (innermost), f32 accumulator scratch.
    params = pltpu.CompilerParams(
        dimension_semantics=("parallel", "parallel", "arbitrary"),
        vmem_limit_bytes=_VMEM_LIMIT)
    return pl.pallas_call(
        _linear_kernel_acc,
        out_shape=jax.ShapeDtypeStruct((Mp, Np), out_dtype),
        grid=(nj, ni, nk),
        in_specs=[
            pl.BlockSpec((tm, tk), lambda j, i, k: (i, k)),
            pl.BlockSpec((tk, tn), lambda j, i, k: (k, j)),
            pl.BlockSpec((1, tn), lambda j, i, k: (0, j)),
        ],
        out_specs=pl.BlockSpec((tm, tn), lambda j, i, k: (i, j)),
        scratch_shapes=[pltpu.VMEM((tm, tn), jnp.float32)],
        compiler_params=params,
        cost_estimate=cost,
    )(x2d, wT, b2d)


# ------------------------------ module API ----------------------------------

def make_generator(weight, bias, compute_dtype=None):
    """Build the Generator forward fn.

    weight: (vocab_size, d_model) -- PyTorch nn.Linear layout.
    bias:   (vocab_size,)
    compute_dtype: e.g. jnp.bfloat16 to halve the weight HBM stream on
        v6e/v7x (f32 accumulation is kept inside the kernel).  Default None
        keeps f32 and matches nn.Linear numerics exactly.

    The weight transpose, zero padding and dtype cast happen ONCE here.
    """
    vocab, d_model = weight.shape
    assert bias.shape == (vocab,)

    w_dtype = jnp.dtype(compute_dtype) if compute_dtype is not None \
        else jnp.dtype(weight.dtype)
    xb = w_dtype.itemsize if compute_dtype is not None else 4
    wb = w_dtype.itemsize
    ob = 4
    # Sub-32-bit operands pack multiple rows per sublane: align tm accordingly.
    row_align = {4: 8, 2: 16, 1: 32}.get(xb, 8)

    tm_cap, tk, tn, use_acc = _choose_plan(d_model, vocab, xb, wb, ob, row_align)
    Kp = _round_up(d_model, tk)
    Np = _round_up(vocab, tn)

    # One-time weight prep (NOT in the per-call jit path).
    wT = jnp.asarray(weight, w_dtype).T                       # (d_model, vocab)
    wT = jnp.pad(wT, ((0, Kp - d_model), (0, Np - vocab)))
    b2d = jnp.pad(jnp.asarray(bias, jnp.float32),
                  (0, Np - vocab)).reshape(1, Np)

    @jax.jit
    def _fwd(x, w_p, b_p):
        *lead, k_in = x.shape
        assert k_in == d_model
        out_dtype = x.dtype
        x2d = x.reshape(-1, d_model)
        if compute_dtype is not None:
            # TODO(synk): ideally the producing layer already emits
            # compute_dtype activations; cast kept here for a standalone demo.
            x2d = x2d.astype(compute_dtype)
        m = x2d.shape[0]
        tm = min(tm_cap, _round_up(m, row_align))
        mp = _round_up(m, tm)
        if (mp, Kp) != (m, d_model):
            x2d = jnp.pad(x2d, ((0, mp - m), (0, Kp - d_model)))
        y = _pallas_linear(x2d, w_p, b_p, tm, tk, tn, use_acc, out_dtype)
        return y[:m, :vocab].reshape(*lead, vocab)

    return functools.partial(_fwd, w_p=wT, b_p=b2d)


# ---------------------------------- main ------------------------------------

if __name__ == "__main__":
    # Small shapes consistent with the module.
    B, T = 2, 8
    d_model, vocab_size = 32, 13

    key = jax.random.PRNGKey(0)
    kx, kw, kb = jax.random.split(key, 3)

    x = jax.random.normal(kx, (B, T, d_model), jnp.float32)
    # nn.Linear-style parameters (PyTorch layout: weight is (vocab, d_model)).
    limit = 1.0 / (d_model ** 0.5)
    weight = jax.random.uniform(kw, (vocab_size, d_model), jnp.float32,
                                -limit, limit)
    bias = jax.random.uniform(kb, (vocab_size,), jnp.float32, -limit, limit)

    # Default f32 path: exact nn.Linear numerics.
    generator = make_generator(weight, bias)
    logits = generator(x)
    jax.block_until_ready(logits)

    assert logits.shape == (B, T, vocab_size), logits.shape
    assert bool(jnp.all(jnp.isfinite(logits)))

    ref = jnp.einsum("btd,vd->btv", x, weight,
                     precision=jax.lax.Precision.HIGHEST) + bias
    assert bool(jnp.allclose(logits, ref, rtol=1e-3, atol=1e-3)), float(
        jnp.max(jnp.abs(logits - ref)))

    # Optional bf16-operand path (recommended default on v6e/v7x): weight cast
    # once at init, f32 accumulation retained in the kernel.
    generator_bf16 = make_generator(weight, bias, compute_dtype=jnp.bfloat16)
    logits_bf16 = generator_bf16(x)
    jax.block_until_ready(logits_bf16)
    assert bool(jnp.allclose(logits_bf16, ref, rtol=3e-2, atol=3e-2))

    print("KERNEL_OK")
</pallas_src>

<mosaic_0001>
module attributes {stable_mosaic.version = 11 : i64} {
  func.func @_linear_kernel(%arg0: i32, %arg1: i32, %arg2: memref<16x128xf32, #tpu.memory_space<vmem>>, %arg3: memref<128x128xf32, #tpu.memory_space<vmem>>, %arg4: memref<1x128xf32, #tpu.memory_space<vmem>>, %arg5: memref<16x128xf32, #tpu.memory_space<vmem>>) attributes {dimension_semantics = [#tpu.dimension_semantics<parallel>, #tpu.dimension_semantics<parallel>], iteration_bounds = array<i64: 1, 1>, scalar_prefetch = 0 : i64, scratch_operands = 0 : i64, tpu.core_type = #tpu.core_type<tc>, window_params = [{transform_indices = @transform_0, window_bounds = array<i64: 16, 128>}, {transform_indices = @transform_1, window_bounds = array<i64: 128, 128>}, {transform_indices = @transform_2, window_bounds = array<i64: 1, 128>}, {transform_indices = @transform_3, window_bounds = array<i64: 16, 128>}]} {
    %c0 = arith.constant 0 : index
    %c0_0 = arith.constant 0 : index
    %0 = vector.load %arg2[%c0, %c0_0] : memref<16x128xf32, #tpu.memory_space<vmem>>, vector<16x128xf32>
    %c0_1 = arith.constant 0 : index
    %c0_2 = arith.constant 0 : index
    %1 = vector.load %arg3[%c0_1, %c0_2] : memref<128x128xf32, #tpu.memory_space<vmem>>, vector<128x128xf32>
    %cst = arith.constant dense<0.000000e+00> : vector<16x128xf32>
    %2 = tpu.matmul %0, %1, %cst {dimension_numbers = #tpu.dot_dimension_numbers<[1], [0], [0], [1], [0, 0, 1, 1], [], []>} : vector<16x128xf32>, vector<128x128xf32>, vector<16x128xf32> -> vector<16x128xf32>
    %c0_3 = arith.constant 0 : index
    %c0_4 = arith.constant 0 : index
    %3 = vector.load %arg4[%c0_3, %c0_4] : memref<1x128xf32, #tpu.memory_space<vmem>>, vector<1x128xf32>
    %4 = vector.broadcast %3 : vector<1x128xf32> to vector<16x128xf32>
    %5 = arith.addf %2, %4 : vector<16x128xf32>
    %c0_5 = arith.constant 0 : index
    %c0_6 = arith.constant 0 : index
    %6 = vector.load %arg5[%c0_5, %c0_6] : memref<16x128xf32, #tpu.memory_space<vmem>>, vector<16x128xf32>
    tpu.vector_store %arg5[%c0_5, %c0_6], %5 {strides = array<i32>} : memref<16x128xf32, #tpu.memory_space<vmem>>, vector<16x128xf32>,
    return
  }
  func.func @transform_0(%arg0: i32, %arg1: i32) -> (i32, i32) {
    %c0_i32 = arith.constant 0 : i32
    %c0_i32_0 = arith.constant 0 : i32
    return %arg1, %c0_i32 : i32, i32
  }
  func.func @transform_1(%arg0: i32, %arg1: i32) -> (i32, i32) {
    %c0_i32 = arith.constant 0 : i32
    %c0_i32_0 = arith.constant 0 : i32
    return %c0_i32, %arg0 : i32, i32
  }
  func.func @transform_2(%arg0: i32, %arg1: i32) -> (i32, i32) {
    %c0_i32 = arith.constant 0 : i32
    %c0_i32_0 = arith.constant 0 : i32
    return %c0_i32, %arg0 : i32, i32
  }
  func.func @transform_3(%arg0: i32, %arg1: i32) -> (i32, i32) {
    %c0_i32 = arith.constant 0 : i32
    return %arg1, %arg0 : i32, i32
  }
}

</mosaic_0001>

<bundles_post_ra>
// kernel: _fwd.1
= control target key start
LH: loop header
LB: loop body
LE: loop exit
PB: predicated region body
PF: predicated region fallthrough
CT: control target
= control target key end

     0   :  { %8 = vsyncpa [#allocation3], 0  ;;  %s248_s12 = smov [#allocation2]   ;;  %s298_s0 = inlined_call_operand.vmem [shape: f32[16,128], index: 0, kind: input, shape index: {}]   ;;  %s299_s1 = inlined_call_operand.hbm [shape: f32[128,128], index: 1, kind: input, shape index: {}]   ;;  %s300_s2 = inlined_call_operand.vmem [shape: f32[1,128], index: 2, kind: input, shape index: {}]   ;;  %s301_s3 = inlined_call_operand.vmem [shape: f32[16,128], index: 3, kind: output, shape index: {}]  }
   0x1   :  { %s16_s13 = sshll.u32 %s248_s12, 4  ;;  %s224_s16 = scalar_lea.hbm %s299_s1, 2048  ;;  %s17_s13 = int_to_ptr.vmem [resolvable:$true] %s16_s13 }
   0x2   :  { %p225_p0 = scmp.ne.s32.totalorder %s299_s1, %s224_s16  ;;  %p228_p1 = scmp.lt.u32.totalorder %s224_s16, %s299_s1 }
   0x4   :  { %p230_p2 = pnand %p228_p1, %p225_p0 }
   0x6   :  { %233 = shalt.err (!%p230_p2)
}
   0x7   :  { %s234_s21 = scalar_lea.vmem %s17_s13, 2048  ;;  %p239_p4 = scmp.lt.s32.totalorder %s17_s13, %s17_s13 }
   0x8   :  { %p235_p3 = scmp.ne.s32.totalorder %s17_s13, %s234_s21  ;;  %p240_p5 = scmp.lt.s32.totalorder %s234_s21, %s234_s21 }
   0xa   :  { %p241_p6 = por %p240_p5, %p239_p4 }
   0xc   :  { %p242_p7 = pnand %p241_p6, %p235_p3 }
   0xe   :  { %245 = shalt.err (!%p242_p7)
}
   0xf   :  { %s249_s22 = smov 128   ;;  %s250_s23 = smov 8  }
  0x10   :  { %22 = dma.hbm_to_vmem [thread:$0]  %s299_s1, 2048, %s17_s13, [#allocation3], %s249_s22, %s249_s22, %s250_s23  }
  0x11   :  { %246 = dma.done.wait [#allocation3], 2048  }
  0x12   :  { %247 = vsyncadd [#allocation3], 4294965248  ;;  %v30_v0 = vld [vmem:[#allocation2] sm:$0xff]  ;;  %v31_v1 = vld [vmem:[#allocation2 + $0x8] sm:$0xff] }
  0x13   :  { %v32_v2 = vld [vmem:[#allocation2 + $0x10] sm:$0xff]  ;;  %v189_v3 = vpack.c.bf16 %v31_v1, %v30_v0  ;;  %v33_v4 = vld [vmem:[#allocation2 + $0x18] sm:$0xff]  ;;  %v34_v6 = vld [vmem:[#allocation2 + $0x20] sm:$0xff] }
  0x14   :  { %v193_v5 = vpack.c.bf16 %v33_v4, %v32_v2  ;;  %v35_v7 = vld [vmem:[#allocation2 + $0x28] sm:$0xff]  ;;  %v28_v9 = vld [vmem:[%s298_s0] sm:$0xff]  ;;  %v36_v10 = vld [vmem:[#allocation2 + $0x30] sm:$0xff] }
  0x15   :  { %190 = vmatprep.subr.bf16.mxu0 %v189_v3  ;;  %v197_v8 = vpack.c.bf16 %v35_v7, %v34_v6  ;;  %v37_v11 = vld [vmem:[#allocation2 + $0x38] sm:$0xff]  ;;  %186 = vmatprep.mubr.f32.mxu0 %v28_v9  ;;  %v38_v13 = vld [vmem:[#allocation2 + $0x40] sm:$0xff]  ;;  %v39_v14 = vld [vmem:[#allocation2 + $0x48] sm:$0xff] }
  0x16   :  { %192 = vmatpush3.bf16.msra.mxu0 %v189_v3  ;;  %v201_v12 = vpack.c.bf16 %v37_v11, %v36_v10  ;;  %v205_v15 = vpack.c.bf16 %v39_v14, %v38_v13  ;;  %v40_v16 = vld [vmem:[#allocation2 + $0x50] sm:$0xff]  ;;  %v41_v17 = vld [vmem:[#allocation2 + $0x58] sm:$0xff]  ;;  %v42_v19 = vld [vmem:[#allocation2 + $0x60] sm:$0xff] }
  0x17   :  { %194 = vmatprep.subr.bf16.mxu0 %v193_v5  ;;  %v209_v18 = vpack.c.bf16 %v41_v17, %v40_v16  ;;  %v43_v20 = vld [vmem:[#allocation2 + $0x68] sm:$0xff]  ;;  %v44_v22 = vld [vmem:[#allocation2 + $0x70] sm:$0xff]  ;;  %v45_v23 = vld [vmem:[#allocation2 + $0x78] sm:$0xff] }
  0x18   :  { %v213_v21 = vpack.c.bf16 %v43_v20, %v42_v19  ;;  %v217_v24 = vpack.c.bf16 %v45_v23, %v44_v22  ;;  %v29_v25 = vld [vmem:[%s298_s0 + $0x8] sm:$0xff]  ;;  %v135_v26 = vld [vmem:[%s300_s2] ss:$0 sm:$0xff] }
  0x1a   :  { %196 = vmatpush3.bf16.msra.mxu0 %v193_v5 }
  0x1b   :  { %198 = vmatprep.subr.bf16.mxu0 %v197_v8 }
  0x1e   :  { %200 = vmatpush3.bf16.msra.mxu0 %v197_v8 }
  0x1f   :  { %202 = vmatprep.subr.bf16.mxu0 %v201_v12 }
  0x22   :  { %204 = vmatpush3.bf16.msra.mxu0 %v201_v12 }
  0x23   :  { %206 = vmatprep.subr.bf16.mxu0 %v205_v15 }
  0x26   :  { %208 = vmatpush3.bf16.msra.mxu0 %v205_v15 }
  0x27   :  { %210 = vmatprep.subr.bf16.mxu0 %v209_v18 }
  0x2a   :  { %212 = vmatpush3.bf16.msra.mxu0 %v209_v18 }
  0x2b   :  { %214 = vmatprep.subr.bf16.mxu0 %v213_v21 }
  0x2e   :  { %216 = vmatpush3.bf16.msra.mxu0 %v213_v21 }
  0x2f   :  { %218 = vmatprep.subr.bf16.mxu0 %v217_v24 }
  0x32   :  { %220 = vmatpush3.bf16.msra.mxu0 %v217_v24 }
  0x35   :  { %187 = vmatmul.mubr.f32.vlgmr.msra.gmra.mrb[0].mxu0 %v29_v25 }
 0x108   :  { %v188_v27 = vpop.f32.mrb[0].mxu0 }
 0x109   :  { %v125_v28 = vadd.f32 %v188_v27, %v135_v26  ;;  %v119_v29 = vpop.f32.mrb[1].mxu0 }
 0x10a   :  { %v120_v30 = vadd.f32 %v135_v26, %v119_v29 }
 0x10b   :  { %129 = vst [vmem:[%s301_s3 + $0x8] sm:$0xff] %v125_v28 }
 0x10c   :  { %128 = vst [vmem:[%s301_s3] sm:$0xff] %v120_v30 }
 0x10d   :  { %134 = vsyncpa [#allocation3], 1 }

</bundles_post_ra>
